<compile_context>
chip_gen: v7x
topology: tpu7x:2x2x1
jax: 0.10.0
libtpu: 0.0.40
codegen_flags: <defaults>
</compile_context>

<pallas_src>
import functools

import jax
import jax.numpy as jnp
from jax.experimental import pallas as pl
from jax.experimental.pallas import tpu as pltpu


def _softplus(z):
    # numerically stable softplus, used identically in kernel and reference
    return jnp.maximum(z, 0.0) + jnp.log1p(jnp.exp(-jnp.abs(z)))


def moe_kernel(x_ref, w_all_ref, be_ref, o_ref, acc_ref, *,
               k, n, out_dim, total_bs, use_bf16):
    bi = pl.program_id(0)

    @pl.when(bi == 0)
    def _init():
        acc_ref[...] = jnp.zeros_like(acc_ref)

    x = x_ref[...]                                        # (BT, IN) f32
    bt = x.shape[0]
    nod = n * out_dim

    # ---- single fused lane-dense matmul: [experts | gate | noise] ----
    if use_bf16:
        y = jnp.dot(x.astype(jnp.bfloat16),
                    w_all_ref[...].astype(jnp.bfloat16),
                    preferred_element_type=jnp.float32)   # (BT, N*OUT + 2N)
    else:
        y = jnp.dot(x, w_all_ref[...],
                    preferred_element_type=jnp.float32)   # (BT, N*OUT + 2N)

    # expert activations (slice starts at lane 0 -> aligned, zero-cost)
    h_all = y[:, :nod] + be_ref[...]
    a_all = jax.nn.sigmoid(h_all)                         # (BT, N*OUT), EUP

    # routing logits (slice starts at lane n*out_dim, a multiple of 128 here)
    gz = y[:, nod:nod + 2 * n]                            # (BT, 2N)
    g = gz[:, :n]
    z = gz[:, n:2 * n]
    logits = g + _softplus(z)
    logits = logits - jnp.max(logits, axis=-1, keepdims=True)
    ex = jnp.exp(logits)
    probs = ex / jnp.sum(ex, axis=-1, keepdims=True)      # (BT, N)

    # ---- top-k (values descending; ties -> lowest index, like torch.topk) ----
    idx = jax.lax.broadcasted_iota(jnp.int32, (bt, n), 1)
    avail = jnp.ones((bt, n), dtype=jnp.bool_)
    selected = jnp.zeros((bt, n), dtype=jnp.bool_)
    top_vals = []   # each (BT, 1), descending order
    top_args = []   # each (BT, 1), int32 expert index
    for _ in range(k):
        masked = jnp.where(avail, probs, -jnp.inf)
        mx = jnp.max(masked, axis=-1, keepdims=True)
        arg = jnp.min(jnp.where(masked == mx, idx, n), axis=-1, keepdims=True)
        onehot = idx == arg
        top_vals.append(mx)
        top_args.append(arg)
        avail = jnp.logical_and(avail, jnp.logical_not(onehot))
        selected = jnp.logical_or(selected, onehot)

    # rank[b, i] = number of selected experts with index < i (ascending order)
    rank = jnp.zeros((bt, n), jnp.int32)
    for r in range(k):
        rank = rank + (top_args[r] < idx).astype(jnp.int32)

    # weight[b, i] = r-th descending top-k value if expert i is the r-th
    # selected expert in ascending index order, else 0  (reproduces the quirk)
    weight = jnp.zeros((bt, n), jnp.float32)
    for r in range(k):
        weight = weight + jnp.where(
            jnp.logical_and(selected, rank == r), top_vals[r], 0.0)

    # ---- weighted sum over experts via static lane slices of the fused tile ----
    tile_acc = jnp.zeros((bt, out_dim), jnp.float32)
    for e in range(n):
        tile_acc = tile_acc + (
            weight[:, e:e + 1] * a_all[:, e * out_dim:(e + 1) * out_dim])

    # ---- aggregation (mean over dim 0) ----
    # per-step: pure VPU add on a sublane-full (bt, out_dim) accumulator
    acc_ref[...] += tile_acc

    @pl.when(bi == pl.num_programs(0) - 1)
    def _finalize():
        # single cross-sublane reduction + mean scale, done once at the end
        o_ref[...] = jnp.sum(acc_ref[...], axis=0, keepdims=True) * (
            1.0 / float(total_bs))


def moe_forward(x, wg, wn, we, be, k, *, bt=None):
    bs, in_dim = x.shape
    n, _, out_dim = we.shape
    if bt is None:
        bt = bs                     # toy size: one grid step, max MXU row use
    assert bs % bt == 0, "batch must be divisible by the batch tile"
    assert k <= n

    nod = n * out_dim

    # host-side fusions (layout plumbing, not compute)
    we_flat = jnp.transpose(we, (1, 0, 2)).reshape(in_dim, nod)   # (IN, N*OUT)
    # expert columns first so both in-kernel splits are 128-lane aligned
    w_all = jnp.concatenate([we_flat, wg, wn], axis=1)            # (IN, N*OUT+2N)
    be_flat = be.reshape(1, nod)                                  # (1, N*OUT)

    # bf16 MXU operands only at realistic dims (keeps 1e-5 check at toy size)
    use_bf16 = (in_dim >= 512) and (out_dim >= 128)

    kernel = functools.partial(
        moe_kernel, k=k, n=n, out_dim=out_dim, total_bs=bs, use_bf16=use_bf16)

    out = pl.pallas_call(
        kernel,
        out_shape=jax.ShapeDtypeStruct((1, out_dim), jnp.float32),
        grid_spec=pltpu.PrefetchScalarGridSpec(
            num_scalar_prefetch=0,
            grid=(bs // bt,),
            in_specs=[
                pl.BlockSpec((bt, in_dim), lambda i: (i, 0)),            # streamed
                pl.BlockSpec((in_dim, nod + 2 * n), lambda i: (0, 0)),   # resident
                pl.BlockSpec((1, nod), lambda i: (0, 0)),                # resident
            ],
            out_specs=pl.BlockSpec((1, out_dim), lambda i: (0, 0)),
            scratch_shapes=[pltpu.VMEM((bt, out_dim), jnp.float32)],
        ),
        compiler_params=pltpu.CompilerParams(
            dimension_semantics=("arbitrary",),     # batch axis is a reduction
            vmem_limit_bytes=32 * 1024 * 1024,
        ),
    )(x, w_all, be_flat)
    return out[0]


def moe_reference(x, wg, wn, we, be, k):
    """Plain-JAX mirror of the PyTorch forward, for verification."""
    logits = x @ wg + _softplus(x @ wn)
    probs = jax.nn.softmax(logits, axis=-1)
    vals, idxs = jax.lax.top_k(probs, k)                   # descending
    res = []
    for b in range(x.shape[0]):
        sel = sorted(int(i) for i in idxs[b])              # ascending expert idx
        outs = jnp.stack(
            [jax.nn.sigmoid(x[b] @ we[i] + be[i]) for i in sel])   # (k, OUT)
        res.append(vals[b] @ outs)
    return jnp.mean(jnp.stack(res, axis=0), axis=0)


if __name__ == "__main__":
    bs, in_dim, out_dim, n, k = 16, 32, 32, 4, 2

    key = jax.random.PRNGKey(0)
    kx, kg, kn, kw, kb = jax.random.split(key, 5)
    x = jax.random.normal(kx, (bs, in_dim), jnp.float32)
    scale = 1.0 / float(jnp.sqrt(jnp.float32(in_dim)))
    wg = jax.random.uniform(kg, (in_dim, n), jnp.float32, -scale, scale)
    wn = jax.random.uniform(kn, (in_dim, n), jnp.float32, -scale, scale)
    we = jax.random.uniform(kw, (n, in_dim, out_dim), jnp.float32, -scale, scale)
    be = jax.random.uniform(kb, (n, out_dim), jnp.float32, -scale, scale)

    out = moe_forward(x, wg, wn, we, be, k)      # bt defaults to bs -> grid of 1
    out = jax.block_until_ready(out)

    ref = moe_reference(x, wg, wn, we, be, k)
    assert out.shape == (out_dim,)
    assert jnp.allclose(out, ref, rtol=1e-5, atol=1e-5), (out, ref)
    print("KERNEL_OK")
</pallas_src>

<mosaic_0001>
module attributes {stable_mosaic.version = 11 : i64} {
  func.func @moe_kernel(%arg0: i32, %arg1: memref<16x32xf32, #tpu.memory_space<vmem>>, %arg2: memref<32x136xf32, #tpu.memory_space<vmem>>, %arg3: memref<1x128xf32, #tpu.memory_space<vmem>>, %arg4: memref<1x32xf32, #tpu.memory_space<vmem>>, %arg5: memref<16x32xf32, #tpu.memory_space<vmem>>) attributes {dimension_semantics = [#tpu.dimension_semantics<arbitrary>], iteration_bounds = array<i64: 1>, scalar_prefetch = 0 : i64, scratch_operands = 1 : i64, tpu.core_type = #tpu.core_type<tc>, window_params = [{transform_indices = @transform_0, window_bounds = array<i64: 16, 32>}, {pipeline_mode = #tpu.pipeline_mode<synchronous>, transform_indices = @transform_1, window_bounds = array<i64: 32, 136>}, {pipeline_mode = #tpu.pipeline_mode<synchronous>, transform_indices = @transform_2, window_bounds = array<i64: 1, 128>}, {pipeline_mode = #tpu.pipeline_mode<synchronous>, transform_indices = @transform_3, window_bounds = array<i64: 1, 32>}]} {
    %c0_i32 = arith.constant 0 : i32
    %0 = arith.cmpi eq, %arg0, %c0_i32 : i32
    %1 = arith.extui %0 : i1 to i32
    %c0_i32_0 = arith.constant 0 : i32
    %2 = arith.cmpi ne, %1, %c0_i32_0 : i32
    scf.if %2 {
      %cst_31 = arith.constant 0.000000e+00 : f32
      %120 = vector.broadcast %cst_31 : f32 to vector<16x32xf32>
      %c0_32 = arith.constant 0 : index
      %c0_33 = arith.constant 0 : index
      %121 = vector.load %arg5[%c0_32, %c0_33] : memref<16x32xf32, #tpu.memory_space<vmem>>, vector<16x32xf32>
      tpu.vector_store %arg5[%c0_32, %c0_33], %120 {strides = array<i32>} : memref<16x32xf32, #tpu.memory_space<vmem>>, vector<16x32xf32>,
    } else {
    }
    %c0 = arith.constant 0 : index
    %c0_1 = arith.constant 0 : index
    %3 = vector.load %arg1[%c0, %c0_1] : memref<16x32xf32, #tpu.memory_space<vmem>>, vector<16x32xf32>
    %c0_2 = arith.constant 0 : index
    %c0_3 = arith.constant 0 : index
    %4 = vector.load %arg2[%c0_2, %c0_3] : memref<32x136xf32, #tpu.memory_space<vmem>>, vector<32x136xf32>
    %cst = arith.constant dense<0.000000e+00> : vector<16x136xf32>
    %5 = tpu.matmul %3, %4, %cst {dimension_numbers = #tpu.dot_dimension_numbers<[1], [0], [0], [1], [0, 0, 1, 1], [], []>} : vector<16x32xf32>, vector<32x136xf32>, vector<16x136xf32> -> vector<16x136xf32>
    %6 = vector.extract_strided_slice %5 {offsets = [0, 0], sizes = [16, 128], strides = [1, 1]} : vector<16x136xf32> to vector<16x128xf32>
    %c0_4 = arith.constant 0 : index
    %c0_5 = arith.constant 0 : index
    %7 = vector.load %arg3[%c0_4, %c0_5] : memref<1x128xf32, #tpu.memory_space<vmem>>, vector<1x128xf32>
    %8 = vector.broadcast %7 : vector<1x128xf32> to vector<16x128xf32>
    %9 = arith.addf %6, %8 : vector<16x128xf32>
    %10 = arith.negf %9 : vector<16x128xf32>
    %11 = math.exp %10 : vector<16x128xf32>
    %cst_6 = arith.constant 1.000000e+00 : f32
    %12 = vector.broadcast %cst_6 : f32 to vector<16x128xf32>
    %13 = arith.addf %12, %11 : vector<16x128xf32>
    %14 = arith.divf %12, %13 : vector<16x128xf32>
    %15 = vector.extract_strided_slice %5 {offsets = [0, 128], sizes = [16, 8], strides = [1, 1]} : vector<16x136xf32> to vector<16x8xf32>
    %16 = vector.extract_strided_slice %15 {offsets = [0, 0], sizes = [16, 4], strides = [1, 1]} : vector<16x8xf32> to vector<16x4xf32>
    %17 = vector.extract_strided_slice %15 {offsets = [0, 4], sizes = [16, 4], strides = [1, 1]} : vector<16x8xf32> to vector<16x4xf32>
    %cst_7 = arith.constant 0.000000e+00 : f32
    %18 = vector.broadcast %cst_7 : f32 to vector<16x4xf32>
    %19 = arith.maximumf %17, %18 : vector<16x4xf32>
    %20 = math.absf %17 : vector<16x4xf32>
    %cst_8 = arith.constant 0.000000e+00 : f32
    %21 = vector.broadcast %cst_8 : f32 to vector<16x4xf32>
    %22 = arith.subf %21, %20 : vector<16x4xf32>
    %23 = math.exp %22 : vector<16x4xf32>
    %24 = math.log1p %23 : vector<16x4xf32>
    %25 = arith.addf %19, %24 : vector<16x4xf32>
    %26 = arith.addf %16, %25 : vector<16x4xf32>
    %cst_9 = arith.constant dense<0xFF800000> : vector<16xf32>
    %27 = vector.multi_reduction <maximumf>, %26, %cst_9 [1] : vector<16x4xf32> to vector<16xf32>
    %28 = vector.shape_cast %27 : vector<16xf32> to vector<16x1xf32>
    %29 = vector.broadcast %28 : vector<16x1xf32> to vector<16x4xf32>
    %30 = arith.subf %26, %29 : vector<16x4xf32>
    %31 = math.exp %30 : vector<16x4xf32>
    %cst_10 = arith.constant dense<0.000000e+00> : vector<16xf32>
    %32 = vector.multi_reduction <add>, %31, %cst_10 [1] : vector<16x4xf32> to vector<16xf32>
    %33 = vector.shape_cast %32 : vector<16xf32> to vector<16x1xf32>
    %34 = vector.broadcast %33 : vector<16x1xf32> to vector<16x4xf32>
    %35 = arith.divf %31, %34 : vector<16x4xf32>
    %36 = tpu.iota {dimensions = array<i32: 1>} : vector<16x4xi32>
    %true = arith.constant true
    %37 = vector.broadcast %true : i1 to vector<16x4xi1>
    %false = arith.constant false
    %38 = vector.broadcast %false : i1 to vector<16x4xi1>
    %cst_11 = arith.constant 0xFF800000 : f32
    %39 = vector.broadcast %cst_11 : f32 to vector<16x4xf32>
    %40 = arith.select %37, %35, %39 : vector<16x4xi1>, vector<16x4xf32>
    %cst_12 = arith.constant dense<0xFF800000> : vector<16xf32>
    %41 = vector.multi_reduction <maximumf>, %40, %cst_12 [1] : vector<16x4xf32> to vector<16xf32>
    %42 = vector.shape_cast %41 : vector<16xf32> to vector<16x1xf32>
    %43 = vector.broadcast %42 : vector<16x1xf32> to vector<16x4xf32>
    %44 = arith.cmpf oeq, %40, %43 : vector<16x4xf32>
    %c4_i32 = arith.constant 4 : i32
    %45 = vector.broadcast %c4_i32 : i32 to vector<16x4xi32>
    %46 = arith.select %44, %36, %45 : vector<16x4xi1>, vector<16x4xi32>
    %cst_13 = arith.constant dense<2147483647> : vector<16xi32>
    %47 = vector.multi_reduction <minsi>, %46, %cst_13 [1] : vector<16x4xi32> to vector<16xi32>
    %48 = vector.shape_cast %47 : vector<16xi32> to vector<16x1xi32>
    %49 = vector.broadcast %48 : vector<16x1xi32> to vector<16x4xi32>
    %50 = arith.cmpi eq, %36, %49 : vector<16x4xi32>
    %cst_14 = arith.constant dense<true> : vector<16x4xi1>
    %51 = arith.xori %50, %cst_14 : vector<16x4xi1>
    %52 = arith.andi %37, %51 : vector<16x4xi1>
    %53 = arith.ori %38, %50 : vector<16x4xi1>
    %cst_15 = arith.constant 0xFF800000 : f32
    %54 = vector.broadcast %cst_15 : f32 to vector<16x4xf32>
    %55 = arith.select %52, %35, %54 : vector<16x4xi1>, vector<16x4xf32>
    %cst_16 = arith.constant dense<0xFF800000> : vector<16xf32>
    %56 = vector.multi_reduction <maximumf>, %55, %cst_16 [1] : vector<16x4xf32> to vector<16xf32>
    %57 = vector.shape_cast %56 : vector<16xf32> to vector<16x1xf32>
    %58 = vector.broadcast %57 : vector<16x1xf32> to vector<16x4xf32>
    %59 = arith.cmpf oeq, %55, %58 : vector<16x4xf32>
    %c4_i32_17 = arith.constant 4 : i32
    %60 = vector.broadcast %c4_i32_17 : i32 to vector<16x4xi32>
    %61 = arith.select %59, %36, %60 : vector<16x4xi1>, vector<16x4xi32>
    %cst_18 = arith.constant dense<2147483647> : vector<16xi32>
    %62 = vector.multi_reduction <minsi>, %61, %cst_18 [1] : vector<16x4xi32> to vector<16xi32>
    %63 = vector.shape_cast %62 : vector<16xi32> to vector<16x1xi32>
    %64 = vector.broadcast %63 : vector<16x1xi32> to vector<16x4xi32>
    %65 = arith.cmpi eq, %36, %64 : vector<16x4xi32>
    %66 = arith.ori %53, %65 : vector<16x4xi1>
    %c0_i32_19 = arith.constant 0 : i32
    %67 = vector.broadcast %c0_i32_19 : i32 to vector<16x4xi32>
    %68 = vector.broadcast %48 : vector<16x1xi32> to vector<16x4xi32>
    %69 = arith.cmpi slt, %68, %36 : vector<16x4xi32>
    %70 = arith.extui %69 : vector<16x4xi1> to vector<16x4xi32>
    %71 = arith.addi %67, %70 : vector<16x4xi32>
    %72 = vector.broadcast %63 : vector<16x1xi32> to vector<16x4xi32>
    %73 = arith.cmpi slt, %72, %36 : vector<16x4xi32>
    %74 = arith.extui %73 : vector<16x4xi1> to vector<16x4xi32>
    %75 = arith.addi %71, %74 : vector<16x4xi32>
    %cst_20 = arith.constant 0.000000e+00 : f32
    %76 = vector.broadcast %cst_20 : f32 to vector<16x4xf32>
    %c0_i32_21 = arith.constant 0 : i32
    %77 = vector.broadcast %c0_i32_21 : i32 to vector<16x4xi32>
    %78 = arith.cmpi eq, %75, %77 : vector<16x4xi32>
    %79 = arith.andi %66, %78 : vector<16x4xi1>
    %cst_22 = arith.constant 0.000000e+00 : f32
    %80 = vector.shape_cast %42 : vector<16x1xf32> to vector<16x1xf32>
    %81 = vector.broadcast %80 : vector<16x1xf32> to vector<16x4xf32>
    %82 = vector.broadcast %cst_22 : f32 to vector<16x4xf32>
    %83 = arith.select %79, %81, %82 : vector<16x4xi1>, vector<16x4xf32>
    %84 = arith.addf %76, %83 : vector<16x4xf32>
    %c1_i32 = arith.constant 1 : i32
    %85 = vector.broadcast %c1_i32 : i32 to vector<16x4xi32>
    %86 = arith.cmpi eq, %75, %85 : vector<16x4xi32>
    %87 = arith.andi %66, %86 : vector<16x4xi1>
    %cst_23 = arith.constant 0.000000e+00 : f32
    %88 = vector.shape_cast %57 : vector<16x1xf32> to vector<16x1xf32>
    %89 = vector.broadcast %88 : vector<16x1xf32> to vector<16x4xf32>
    %90 = vector.broadcast %cst_23 : f32 to vector<16x4xf32>
    %91 = arith.select %87, %89, %90 : vector<16x4xi1>, vector<16x4xf32>
    %92 = arith.addf %84, %91 : vector<16x4xf32>
    %cst_24 = arith.constant 0.000000e+00 : f32
    %93 = vector.broadcast %cst_24 : f32 to vector<16x32xf32>
    %94 = vector.extract_strided_slice %92 {offsets = [0, 0], sizes = [16, 1], strides = [1, 1]} : vector<16x4xf32> to vector<16x1xf32>
    %95 = vector.extract_strided_slice %14 {offsets = [0, 0], sizes = [16, 32], strides = [1, 1]} : vector<16x128xf32> to vector<16x32xf32>
    %96 = vector.broadcast %94 : vector<16x1xf32> to vector<16x32xf32>
    %97 = arith.mulf %96, %95 : vector<16x32xf32>
    %98 = arith.addf %93, %97 : vector<16x32xf32>
    %99 = vector.extract_strided_slice %92 {offsets = [0, 1], sizes = [16, 1], strides = [1, 1]} : vector<16x4xf32> to vector<16x1xf32>
    %100 = vector.extract_strided_slice %14 {offsets = [0, 32], sizes = [16, 32], strides = [1, 1]} : vector<16x128xf32> to vector<16x32xf32>
    %101 = vector.broadcast %99 : vector<16x1xf32> to vector<16x32xf32>
    %102 = arith.mulf %101, %100 : vector<16x32xf32>
    %103 = arith.addf %98, %102 : vector<16x32xf32>
    %104 = vector.extract_strided_slice %92 {offsets = [0, 2], sizes = [16, 1], strides = [1, 1]} : vector<16x4xf32> to vector<16x1xf32>
    %105 = vector.extract_strided_slice %14 {offsets = [0, 64], sizes = [16, 32], strides = [1, 1]} : vector<16x128xf32> to vector<16x32xf32>
    %106 = vector.broadcast %104 : vector<16x1xf32> to vector<16x32xf32>
    %107 = arith.mulf %106, %105 : vector<16x32xf32>
    %108 = arith.addf %103, %107 : vector<16x32xf32>
    %109 = vector.extract_strided_slice %92 {offsets = [0, 3], sizes = [16, 1], strides = [1, 1]} : vector<16x4xf32> to vector<16x1xf32>
    %110 = vector.extract_strided_slice %14 {offsets = [0, 96], sizes = [16, 32], strides = [1, 1]} : vector<16x128xf32> to vector<16x32xf32>
    %111 = vector.broadcast %109 : vector<16x1xf32> to vector<16x32xf32>
    %112 = arith.mulf %111, %110 : vector<16x32xf32>
    %113 = arith.addf %108, %112 : vector<16x32xf32>
    %c0_25 = arith.constant 0 : index
    %c0_26 = arith.constant 0 : index
    %114 = vector.load %arg5[%c0_25, %c0_26] : memref<16x32xf32, #tpu.memory_space<vmem>>, vector<16x32xf32>
    %115 = arith.addf %114, %113 : vector<16x32xf32>
    %c0_27 = arith.constant 0 : index
    %c0_28 = arith.constant 0 : index
    %116 = vector.load %arg5[%c0_27, %c0_28] : memref<16x32xf32, #tpu.memory_space<vmem>>, vector<16x32xf32>
    tpu.vector_store %arg5[%c0_27, %c0_28], %115 {strides = array<i32>} : memref<16x32xf32, #tpu.memory_space<vmem>>, vector<16x32xf32>,
    %c0_i32_29 = arith.constant 0 : i32
    %117 = arith.cmpi eq, %arg0, %c0_i32_29 : i32
    %118 = arith.extui %117 : i1 to i32
    %c0_i32_30 = arith.constant 0 : i32
    %119 = arith.cmpi ne, %118, %c0_i32_30 : i32
    scf.if %119 {
      %c0_31 = arith.constant 0 : index
      %c0_32 = arith.constant 0 : index
      %120 = vector.load %arg5[%c0_31, %c0_32] : memref<16x32xf32, #tpu.memory_space<vmem>>, vector<16x32xf32>
      %cst_33 = arith.constant dense<0.000000e+00> : vector<32xf32>
      %121 = vector.multi_reduction <add>, %120, %cst_33 [0] : vector<16x32xf32> to vector<32xf32>
      %122 = vector.shape_cast %121 : vector<32xf32> to vector<1x32xf32>
      %cst_34 = arith.constant 6.250000e-02 : f32
      %123 = vector.broadcast %cst_34 : f32 to vector<1x32xf32>
      %124 = arith.mulf %122, %123 : vector<1x32xf32>
      %c0_35 = arith.constant 0 : index
      %c0_36 = arith.constant 0 : index
      %125 = vector.load %arg4[%c0_35, %c0_36] : memref<1x32xf32, #tpu.memory_space<vmem>>, vector<1x32xf32>
      tpu.vector_store %arg4[%c0_35, %c0_36], %124 {strides = array<i32>} : memref<1x32xf32, #tpu.memory_space<vmem>>, vector<1x32xf32>,
    } else {
    }
    return
  }
  func.func @transform_0(%arg0: i32) -> (i32, i32) {
    %c0_i32 = arith.constant 0 : i32
    %c0_i32_0 = arith.constant 0 : i32
    return %arg0, %c0_i32 : i32, i32
  }
  func.func @transform_1(%arg0: i32) -> (i32, i32) {
    %c0_i32 = arith.constant 0 : i32
    %c0_i32_0 = arith.constant 0 : i32
    %c0_i32_1 = arith.constant 0 : i32
    return %c0_i32, %c0_i32_0 : i32, i32
  }
  func.func @transform_2(%arg0: i32) -> (i32, i32) {
    %c0_i32 = arith.constant 0 : i32
    %c0_i32_0 = arith.constant 0 : i32
    %c0_i32_1 = arith.constant 0 : i32
    return %c0_i32, %c0_i32_0 : i32, i32
  }
  func.func @transform_3(%arg0: i32) -> (i32, i32) {
    %c0_i32 = arith.constant 0 : i32
    %c0_i32_0 = arith.constant 0 : i32
    %c0_i32_1 = arith.constant 0 : i32
    return %c0_i32, %c0_i32_0 : i32, i32
  }
}

</mosaic_0001>

<bundles_post_ra>
// kernel: tpu_custom_call.1
= control target key start
LH: loop header
LB: loop body
LE: loop exit
PB: predicated region body
PF: predicated region fallthrough
CT: control target
= control target key end

     0   :  { %8 = vsyncpa [#allocation4], 0  ;;  %s747_s0 = inlined_call_operand.hbm [shape: f32[16,32], index: 0, kind: input, shape index: {}]   ;;  %s748_s1 = inlined_call_operand.hbm [shape: f32[32,136], index: 1, kind: input, shape index: {}]   ;;  %s749_s2 = inlined_call_operand.vmem [shape: f32[1,128], index: 2, kind: input, shape index: {}]   ;;  %s750_s3 = inlined_call_operand.hbm [shape: f32[1,32], index: 3, kind: output, shape index: {}]  }
   0x1   :  { %9 = vsyncpa [#allocation7], 0 }
   0x2   :  { %10 = vsyncpa [#allocation5], 0  ;;  %s595_s12 = smov [#allocation3]   ;;  %s523_s16 = scalar_lea.hbm %s747_s0, 256 }
   0x3   :  { %s16_s13 = sshll.u32 %s595_s12, 4  ;;  %p524_p0 = scmp.ne.s32.totalorder %s747_s0, %s523_s16  ;;  %s17_s13 = int_to_ptr.vmem [resolvable:$true] %s16_s13 }
   0x4   :  { %p527_p1 = scmp.lt.u32.totalorder %s523_s16, %s747_s0 }
   0x6   :  { %p529_p2 = pnand %p527_p1, %p524_p0 }
   0x8   :  { %532 = shalt.err (!%p529_p2)
}
   0x9   :  { %s533_s21 = scalar_lea.vmem %s17_s13, 256  ;;  %p538_p4 = scmp.lt.s32.totalorder %s17_s13, %s17_s13 }
   0xa   :  { %p534_p3 = scmp.ne.s32.totalorder %s17_s13, %s533_s21  ;;  %p539_p5 = scmp.lt.s32.totalorder %s533_s21, %s533_s21 }
   0xc   :  { %p540_p6 = por %p539_p5, %p538_p4 }
   0xe   :  { %p541_p7 = pnand %p540_p6, %p534_p3 }
  0x10   :  { %544 = shalt.err (!%p541_p7)
}
  0x11   :  { %s596_s22 = smov 128   ;;  %s597_s23 = smov 8  }
  0x12   :  { %22 = dma.hbm_to_vmem [thread:$0]  %s747_s0, 256, %s17_s13, [#allocation4], %s596_s22, %s596_s22, %s597_s23  }
  0x13   :  { %s598_s26 = smov [#allocation6]   ;;  %s545_s30 = scalar_lea.hbm %s748_s1, 1024 }
  0x14   :  { %s28_s27 = sshll.u32 %s598_s26, 4  ;;  %p546_p8 = scmp.ne.s32.totalorder %s748_s1, %s545_s30  ;;  %s29_s27 = int_to_ptr.vmem [resolvable:$true] %s28_s27 }
  0x15   :  { %p549_p9 = scmp.lt.u32.totalorder %s545_s30, %s748_s1 }
  0x17   :  { %p551_p10 = pnand %p549_p9, %p546_p8 }
  0x19   :  { %554 = shalt.err (!%p551_p10)
}
  0x1a   :  { %s555_s8 = scalar_lea.vmem %s29_s27, 1024  ;;  %p560_p12 = scmp.lt.s32.totalorder %s29_s27, %s29_s27 }
  0x1b   :  { %p556_p11 = scmp.ne.s32.totalorder %s29_s27, %s555_s8  ;;  %p561_p13 = scmp.lt.s32.totalorder %s555_s8, %s555_s8 }
  0x1d   :  { %p562_p0 = por %p561_p13, %p560_p12 }
  0x1f   :  { %p563_p1 = pnand %p562_p0, %p556_p11 }
  0x21   :  { %566 = shalt.err (!%p563_p1)
}
  0x22   :  { %s599_s0 = smov 256   ;;  %s600_s9 = smov 16  }
  0x23   :  { %34 = dma.hbm_to_vmem [thread:$0]  %s748_s1, 1024, %s29_s27, [#allocation7], %s599_s0, %s599_s0, %s600_s9  }
  0x24   :  { %589 = dma.done.wait [#allocation4], 256  }
  0x25   :  { %590 = vsyncadd [#allocation4], 4294967040 }
  0x26   :  { %591 = dma.done.wait [#allocation7], 1024  }
  0x27   :  { %592 = vsyncadd [#allocation7], 4294966272  ;;  %vm47_vm0 = vcmask 261120   ;;  %v601_v0 = vmov 0.0   ;;  %v53_v1 = vld [vmem:[#allocation6 + $0x8] sm:$0xff]  ;;  %v55_v2 = vld [vmem:[#allocation6 + $0x18] sm:$0xff] }
  0x28   :  { %48 = vst.msk [vmem:[#allocation2] sm:$0xff] %vm47_vm0, %v601_v0  ;;  %49 = vst.msk [vmem:[#allocation2 + $0x8] sm:$0xff] %vm47_vm0, %v601_v0  ;;  %131 = vmatprep.mubr.f32.mxu0 %v601_v0  ;;  %137 = vmatprep.mubr.f32.mxu1 %v601_v0  ;;  %v52_v3 = vld [vmem:[#allocation6] sm:$0xff]  ;;  %v464_v4 = vpack.c.bf16 %v55_v2, %v53_v1  ;;  %v54_v5 = vld [vmem:[#allocation6 + $0x10] sm:$0xff]  ;;  %s602_s1 = smov 124   ;;  %vm205_vm3 = vcmask 31744  }
  0x29   :  { %v57_v6 = vld [vmem:[#allocation6 + $0x28] sm:$0xff]  ;;  %v59_v7 = vld [vmem:[#allocation6 + $0x38] sm:$0xff]  ;;  %v466_v8 = vpack.c.bf16 %v54_v5, %v52_v3  ;;  %v56_v10 = vld [vmem:[#allocation6 + $0x20] sm:$0xff]  ;;  %vm603_vm9 = vmmov 1   ;;  %s608_s14 = smov 96   ;;  %s610_s15 = smov 32  }
  0x2a   :  { %v468_v9 = vpack.c.bf16 %v59_v7, %v57_v6  ;;  %v58_v11 = vld [vmem:[#allocation6 + $0x30] sm:$0xff]  ;;  %465 = vmatprep.subr.bf16.mxu0 %v464_v4  ;;  %472 = vmatprep.subr.bf16.mxu1 %v464_v4  ;;  %v51_v14 = vld [vmem:[#allocation3 + $0x8] sm:$0xff]  ;;  %v228_v7 = vlaneseq  ;;  %s611_s16 = smov [#allocation8]  }
  0x2b   :  { %467 = vmatpush1.bf16.msra.mxu0 %v466_v8  ;;  %474 = vmatpush1.bf16.msra.mxu1 %v466_v8  ;;  %v470_v12 = vpack.c.bf16 %v58_v11, %v56_v10  ;;  %v50_v13 = vld [vmem:[#allocation3] sm:$0xff]  ;;  %s449_s17 = sshll.u32 %s611_s16, 4  ;;  %s450_s17 = int_to_ptr.vmem [resolvable:$true] %s449_s17 }
  0x2c   :  { %469 = vmatprep.subr.bf16.mxu0 %v468_v9  ;;  %473 = vmatprep.subr.bf16.mxu1 %v468_v9  ;;  %v670_v8 = vand.u32 127, %v228_v7  ;;  %v605_v7 = vmov 0   ;;  %s567_s18 = scalar_lea.vmem %s450_s17, 16  ;;  %s571_s19 = scalar_lea.vmem %s450_s17, 32 }
  0x2d   :  { %p568_p2 = scmp.ne.s32.totalorder %s450_s17, %s567_s18  ;;  %p572_p3 = scmp.lt.s32.totalorder %s450_s17, %s450_s17 }
  0x2e   :  { %p573_p4 = scmp.lt.s32.totalorder %s571_s19, %s567_s18 }
  0x2f   :  { %471 = vmatpush1.bf16.msra.mxu0 %v470_v12  ;;  %475 = vmatpush1.bf16.msra.mxu1 %v470_v12 }
  0x30   :  { %p574_p5 = por %p573_p4, %p572_p3 }
  0x32   :  { %459 = vmatmul.mubr.msk.f32.vlgmr.msra.gmra.mrb[0].mxu0 %vm47_vm0, %v50_v13  ;;  %460 = vmatmul.mubr.msk.f32.vlgmr.msra.gmra.mrb[0].mxu1 %vm47_vm0, %v51_v14  ;;  %p575_p6 = pnand %p574_p5, %p568_p2 }
 0x105   :  { %v660_v15 = vpop.f32.mrb[0].mxu0  ;;  %v662_v16 = vpop.f32.mrb[0].mxu1 }
 0x106   :  { %v135_v17 = vpop.f32.mrb[1].mxu0  ;;  %v141_v18 = vpop.f32.mrb[1].mxu1 }
 0x107   :  { %v167_v19 = vand.u32 2147483647, %v135_v17  ;;  %v168_v20 = vand.u32 2147483647, %v141_v18  ;;  %v165_v39 = vmax.f32 %v135_v17, 0.0  ;;  %v166_v45 = vmax.f32 %v141_v18, 0.0 }
 0x109   :  { %v169_v21 = vsub.f32 0.0, %v167_v19  ;;  %v170_v22 = vsub.f32 0.0, %v168_v20 }
 0x10b   :  { %v171_v23 = vmul.f32 1.442695, %v169_v21  ;;  %v173_v24 = vmul.f32 1.442695, %v170_v22 }
 0x10d   :  { %499 = vpow2.f32 %v171_v23 }
 0x10e   :  { %501 = vpow2.f32 %v173_v24 }
 0x117   :  { %v500_v25 = vpop.eup %499 }
 0x118   :  { %v502_v26 = vpop.eup %501  ;;  %v175_v27 = vadd.f32 1.0, %v500_v25  ;;  %v178_v29 = vmul.f32 -0.5, %v500_v25  ;;  %v181_v32 = vand.u32 2147483647, %v500_v25 }
 0x119   :  { %v184_v28 = vadd.f32 1.0, %v502_v26  ;;  %v187_v30 = vmul.f32 -0.5, %v502_v26  ;;  %v190_v35 = vand.u32 2147483647, %v502_v26 }
 0x11a   :  { %503 = vlog2.f32 %v175_v27  ;;  %v179_v31 = vadd.f32 1.0, %v178_v29  ;;  %vm182_vm1 = vcmp.lt.f32.partialorder %v181_v32, 0.0004427343 }
 0x11b   :  { %505 = vlog2.f32 %v184_v28  ;;  %v188_v33 = vadd.f32 1.0, %v187_v30  ;;  %vm191_vm2 = vcmp.lt.f32.partialorder %v190_v35, 0.0004427343 }
 0x11c   :  { %v180_v38 = vmul.f32 %v500_v25, %v179_v31 }
 0x11d   :  { %v189_v41 = vmul.f32 %v502_v26, %v188_v33 }
 0x124   :  { %v504_v34 = vpop.eup %503 }
 0x125   :  { %v506_v36 = vpop.eup %505  ;;  %v177_v37 = vmul.f32 0.6931472, %v504_v34 }
 0x126   :  { %v186_v40 = vmul.f32 0.6931472, %v506_v36 }
 0x127   :  { %v183_v42 = vsel %vm182_vm1, %v180_v38, %v177_v37 }
 0x128   :  { %v193_v43 = vadd.f32 %v183_v42, %v165_v39  ;;  %v192_v44 = vsel %vm191_vm2, %v189_v41, %v186_v40 }
 0x129   :  { %v194_v46 = vadd.f32 %v192_v44, %v166_v45 }
 0x12a   :  { %197 = vrot.lane.b32.xlu0 %v193_v43, %s602_s1 }
 0x12e   :  { %199 = vrot.lane.b32.xlu0 %v194_v46, %s602_s1 }
 0x19c   :  { %v198_v47 = vpop.permute.xlu0 %197 }
 0x19d   :  { %v203_v48 = vadd.f32 %v198_v47, %v135_v17 }
 0x19f   :  { %v206_v49 = vsel %vm205_vm3, %v203_v48, -inf }
 0x1a0   :  { %207 = vmax.xlane.f32.xlu1 %v206_v49  ;;  %v200_v50 = vpop.permute.xlu0 %199 }
 0x1a1   :  { %v204_v51 = vadd.f32 %v200_v50, %v141_v18 }
 0x1a3   :  { %v209_v52 = vsel %vm205_vm3, %v204_v51, -inf }
 0x1a4   :  { %210 = vmax.xlane.f32.xlu1 %v209_v52 }
 0x22d   :  { %v208_v53 = vpop.xlane.xlu1 %207 }
 0x22e   :  { %v212_v54 = vsub.f32 %v203_v48, %v208_v53 }
 0x230   :  { %v214_v55 = vmul.f32 1.442695, %v212_v54 }
 0x231   :  { %v211_v56 = vpop.xlane.xlu1 %210 }
 0x232   :  { %507 = vpow2.f32 %v214_v55  ;;  %v213_v57 = vsub.f32 %v204_v51, %v211_v56 }
 0x234   :  { %v216_v58 = vmul.f32 1.442695, %v213_v57 }
 0x236   :  { %509 = vpow2.f32 %v216_v58 }
 0x23c   :  { %v508_v59 = vpop.eup %507 }
 0x23d   :  { %v218_v60 = vsel %vm205_vm3, %v508_v59, 0.0 }
 0x23e   :  { %219 = vadd.xlane.f32.xlu0 %v218_v60 }
 0x240   :  { %v510_v61 = vpop.eup %509 }
 0x241   :  { %v221_v62 = vsel %vm205_vm3, %v510_v61, 0.0 }
 0x242   :  { %222 = vadd.xlane.f32.xlu1 %v221_v62 }
 0x2cb   :  { %v220_v63 = vpop.xlane.xlu0 %219 }
 0x2cc   :  { %511 = vrcp.f32 %v220_v63 }
 0x2cf   :  { %v223_v0 = vpop.xlane.xlu1 %222 }
 0x2d0   :  { %513 = vrcp.f32 %v223_v0 }
 0x2d6   :  { %v512_v1 = vpop.eup %511 }
 0x2d7   :  { %v225_v2 = vmul.f32 %v512_v1, %v508_v59 }
 0x2d9   :  { %v230_v3 = vsel %vm205_vm3, %v225_v2, -inf }
 0x2da   :  { %v514_v4 = vpop.eup %513  ;;  %231 = vmax.xlane.f32.xlu1 %v230_v3 }
 0x2db   :  { %v227_v5 = vmul.f32 %v514_v4, %v510_v61  ;;  %v604_v61 = vmov 1  }
 0x2dc   :  { %493 = vset.pattern.permute.xlu1 %v604_v61  ;;  %494 = vset.pattern.permute.xlu0 %v604_v61 }
 0x2dd   :  { %v233_v6 = vsel %vm205_vm3, %v227_v5, -inf }
 0x2de   :  { %234 = vmax.xlane.f32.xlu1 %v233_v6 }
 0x367   :  { %v672_v9 = vpop.xlane.xlu1 %231 }
 0x368   :  { %vm236_vm4 = vcmp.eq.f32.partialorder %v225_v2, %v672_v9 }
 0x369   :  { %v238_v10 = vsel %vm236_vm4, %v670_v8, 4 }
 0x36a   :  { %v240_v11 = vsel %vm205_vm3, %v238_v10, 2147483647 }
 0x36b   :  { %v677_v12 = vpop.xlane.xlu1 %234  ;;  %v242_v13 = vshra.s32 %v240_v11, 16  ;;  %v241_v21 = vand.u32 65535, %v240_v11 }
 0x36c   :  { %vm237_vm5 = vcmp.eq.f32.partialorder %v227_v5, %v677_v12 }
 0x36d   :  { %v239_v14 = vsel %vm237_vm5, %v670_v8, 4  ;;  %v244_v17 = vcvt.s32.f32 %v242_v13  ;;  %v243_v23 = vcvt.s32.f32 %v241_v21 }
 0x36e   :  { %v255_v18 = vsel %vm205_vm3, %v239_v14, 2147483647 }
 0x36f   :  { %245 = vmin.xlane.f32.xlu1 %v244_v17  ;;  %v257_v19 = vshra.s32 %v255_v18, 16  ;;  %v256_v24 = vand.u32 65535, %v255_v18 }
 0x371   :  { %v259_v20 = vcvt.s32.f32 %v257_v19  ;;  %v258_v27 = vcvt.s32.f32 %v256_v24 }
 0x373   :  { %260 = vmin.xlane.f32.xlu1 %v259_v20 }
 0x3fc   :  { %v246_v22 = vpop.xlane.xlu1 %245 }
 0x3fd   :  { %vm247_vm6 = vcmp.eq.f32.partialorder %v244_v17, %v246_v22  ;;  %v252_v29 = vcvt.f32.s32 %v246_v22 }
 0x3fe   :  { %v248_v25 = vsel %vm247_vm6, %v243_v23, inf }
 0x3ff   :  { %249 = vmin.xlane.f32.xlu1 %v248_v25  ;;  %v253_v31 = vshll.u32 %v252_v29, 16 }
 0x400   :  { %v261_v26 = vpop.xlane.xlu1 %260 }
 0x401   :  { %vm262_vm7 = vcmp.eq.f32.partialorder %v259_v20, %v261_v26  ;;  %v267_v32 = vcvt.f32.s32 %v261_v26  ;;  %v607_v26 = vmov 3  }
 0x402   :  { %v263_v28 = vsel %vm262_vm7, %v258_v27, inf }
 0x403   :  { %264 = vmin.xlane.f32.xlu1 %v263_v28  ;;  %v268_v36 = vshll.u32 %v267_v32, 16 }
 0x48c   :  { %v250_v30 = vpop.xlane.xlu1 %249 }
 0x48d   :  { %v251_v33 = vcvt.f32.s32 %v250_v30 }
 0x48f   :  { %v682_v34 = vadd.s32 %v253_v31, %v251_v33 }
 0x490   :  { %v265_v35 = vpop.xlane.xlu1 %264 }
 0x491   :  { %v266_v37 = vcvt.f32.s32 %v265_v35  ;;  %vm270_vm8 = vcmp.eq.s32.totalorder %v670_v8, %v682_v34  ;;  %vm320_vm2 = vcmp.lt.s32.totalorder %v682_v34, %v670_v8 }
 0x492   :  { %vm272_vm10 = vmxor %vm270_vm8, %vm603_vm9  ;;  %v322_v10 = vsel %vm320_vm2, 1, %v605_v7 }
 0x493   :  { %v689_v38 = vadd.s32 %v268_v36, %v266_v37  ;;  %v274_v39 = vsel %vm272_vm10, %v225_v2, -inf }
 0x494   :  { %v276_v40 = vsel %vm205_vm3, %v274_v39, -inf }
 0x495   :  { %277 = vmax.xlane.f32.xlu1 %v276_v40  ;;  %vm271_vm11 = vcmp.eq.s32.totalorder %v670_v8, %v689_v38  ;;  %vm321_vm5 = vcmp.lt.s32.totalorder %v689_v38, %v670_v8 }
 0x496   :  { %vm273_vm12 = vmxor %vm271_vm11, %vm603_vm9  ;;  %v323_v17 = vsel %vm321_vm5, 1, %v605_v7 }
 0x497   :  { %v275_v41 = vsel %vm273_vm12, %v227_v5, -inf }
 0x498   :  { %v279_v42 = vsel %vm205_vm3, %v275_v41, -inf }
 0x499   :  { %280 = vmax.xlane.f32.xlu0 %v279_v42 }
 0x522   :  { %v698_v43 = vpop.xlane.xlu1 %277 }
 0x523   :  { %vm282_vm13 = vcmp.eq.f32.partialorder %v274_v39, %v698_v43 }
 0x524   :  { %v284_v44 = vsel %vm282_vm13, %v670_v8, 4 }
 0x525   :  { %v286_v45 = vsel %vm205_vm3, %v284_v44, 2147483647 }
 0x526   :  { %v703_v46 = vpop.xlane.xlu0 %280  ;;  %v288_v47 = vshra.s32 %v286_v45, 16  ;;  %v287_v53 = vand.u32 65535, %v286_v45 }
 0x527   :  { %vm283_vm14 = vcmp.eq.f32.partialorder %v275_v41, %v703_v46 }
 0x528   :  { %v285_v48 = vsel %vm283_vm14, %v670_v8, 4  ;;  %v290_v49 = vcvt.s32.f32 %v288_v47  ;;  %v289_v55 = vcvt.s32.f32 %v287_v53 }
 0x529   :  { %v301_v50 = vsel %vm205_vm3, %v285_v48, 2147483647 }
 0x52a   :  { %291 = vmin.xlane.f32.xlu1 %v290_v49  ;;  %v303_v51 = vshra.s32 %v301_v50, 16  ;;  %v302_v56 = vand.u32 65535, %v301_v50 }
 0x52c   :  { %v305_v52 = vcvt.s32.f32 %v303_v51  ;;  %v304_v59 = vcvt.s32.f32 %v302_v56 }
 0x52e   :  { %306 = vmin.xlane.f32.xlu0 %v305_v52 }
 0x5b7   :  { %v292_v54 = vpop.xlane.xlu1 %291 }
 0x5b8   :  { %vm293_vm15 = vcmp.eq.f32.partialorder %v290_v49, %v292_v54  ;;  %v298_v62 = vcvt.f32.s32 %v292_v54 }
 0x5b9   :  { %v294_v57 = vsel %vm293_vm15, %v289_v55, inf }
 0x5ba   :  { %295 = vmin.xlane.f32.xlu1 %v294_v57  ;;  %v299_v0 = vshll.u32 %v298_v62, 16  ;;  %v420_v57 = vld [vmem:[#allocation2] sm:$0xff] }
 0x5bb   :  { %v307_v58 = vpop.xlane.xlu0 %306 }
 0x5bc   :  { %vm308_vm1 = vcmp.eq.f32.partialorder %v305_v52, %v307_v58  ;;  %v313_v1 = vcvt.f32.s32 %v307_v58 }
 0x5bd   :  { %v309_v60 = vsel %vm308_vm1, %v304_v59, inf }
 0x5be   :  { %310 = vmin.xlane.f32.xlu0 %v309_v60  ;;  %v314_v5 = vshll.u32 %v313_v1, 16 }
 0x647   :  { %v296_v63 = vpop.xlane.xlu1 %295 }
 0x648   :  { %v297_v2 = vcvt.f32.s32 %v296_v63  ;;  %v421_v63 = vld [vmem:[#allocation2 + $0x8] sm:$0xff] }
 0x64a   :  { %v300_v3 = vadd.s32 %v299_v0, %v297_v2 }
 0x64b   :  { %v311_v4 = vpop.xlane.xlu0 %310 }
 0x64c   :  { %vm324_vm3 = vcmp.lt.s32.totalorder %v300_v3, %v670_v8  ;;  %v312_v6 = vcvt.f32.s32 %v311_v4  ;;  %vm316_vm4 = vcmp.eq.s32.totalorder %v670_v8, %v300_v3 }
 0x64d   :  { %v326_v11 = vsel %vm324_vm3, 1, %v605_v7  ;;  %vm318_vm6 = vmor %vm270_vm8, %vm316_vm4 }
 0x64e   :  { %v328_v13 = vadd.s32 %v326_v11, %v322_v10  ;;  %v315_v14 = vadd.s32 %v314_v5, %v312_v6 }
 0x650   :  { %vm330_vm7 = vcmp.eq.s32.totalorder %v328_v13, 0  ;;  %vm338_vm9 = vcmp.eq.s32.totalorder %v328_v13, 1  ;;  %vm325_vm10 = vcmp.lt.s32.totalorder %v315_v14, %v670_v8  ;;  %vm317_vm13 = vcmp.eq.s32.totalorder %v670_v8, %v315_v14  ;;  %v461_v8 = vld [vmem:[%s749_s2] ss:$0 sm:$0xff]  ;;  %s609_s2 = smov 64  }
 0x651   :  { %vm332_vm12 = vmand %vm318_vm6, %vm330_vm7  ;;  %v327_v18 = vsel %vm325_vm10, 1, %v605_v7  ;;  %v152_v28 = vadd.f32 %v461_v8, %v662_v16 }
 0x652   :  { %v334_v19 = vsel %vm332_vm12, %v672_v9, 0.0  ;;  %vm340_vm14 = vmand %vm318_vm6, %vm338_vm9  ;;  %v329_v20 = vadd.s32 %v327_v18, %v323_v17  ;;  %v606_v9 = vmov 2  }
 0x653   :  { %v342_v21 = vsel %vm340_vm14, %v698_v43, 0.0  ;;  %vm319_vm15 = vmor %vm271_vm11, %vm317_vm13  ;;  %v463_v29 = vmul.f32 -1.442695, %v152_v28  ;;  %vm441_vm11 = vcmask 253952  }
 0x654   :  { %vm331_vm8 = vcmp.eq.s32.totalorder %v329_v20, 0  ;;  %vm339_vm1 = vcmp.eq.s32.totalorder %v329_v20, 1  ;;  %v344_v22 = vadd.f32 %v342_v21, %v334_v19 }
 0x655   :  { %vm333_vm2 = vmand %vm319_vm15, %vm331_vm8 }
 0x656   :  { %v335_v23 = vsel %vm333_vm2, %v677_v12, 0.0  ;;  %vm341_vm3 = vmand %vm319_vm15, %vm339_vm1  ;;  %361 = vperm.xlu1 %493, %v344_v22   ;;  %v151_v12 = vadd.f32 %v461_v8, %v660_v15 }
 0x657   :  { %v343_v24 = vsel %vm341_vm3, %v703_v46, 0.0 }
 0x658   :  { %v345_v25 = vadd.f32 %v343_v24, %v335_v23  ;;  %v462_v27 = vmul.f32 -1.442695, %v151_v12 }
 0x65a   :  { %365 = vperm.xlu0 %494, %v345_v25   ;;  %495 = vset.pattern.permute.xlu1 %v606_v9  ;;  %515 = vpow2.f32 %v462_v27 }
 0x65b   :  { %381 = vperm.xlu1 %495, %v344_v22   ;;  %517 = vpow2.f32 %v463_v29 }
 0x65e   :  { %498 = vset.pattern.permute.xlu0 %v607_v26 }
 0x65f   :  { %385 = vperm.xlu1 %495, %v345_v25  }
 0x663   :  { %496 = vset.pattern.permute.xlu1 %v607_v26 }
 0x664   :  { %401 = vperm.xlu1 %496, %v344_v22   ;;  %v516_v30 = vpop.eup %515 }
 0x665   :  { %v159_v31 = vadd.f32 1.0, %v516_v30  ;;  %v518_v32 = vpop.eup %517 }
 0x666   :  { %v160_v33 = vadd.f32 1.0, %v518_v32 }
 0x667   :  { %519 = vrcp.f32 %v159_v31 }
 0x668   :  { %405 = vperm.xlu1 %496, %v345_v25   ;;  %521 = vrcp.f32 %v160_v33 }
 0x66c   :  { %497 = vset.pattern.permute.xlu1 %v605_v7 }
 0x66d   :  { %348 = vperm.xlu1 %497, %v344_v22  }
 0x671   :  { %353 = vperm.xlu1 %497, %v345_v25   ;;  %v520_v34 = vpop.eup %519 }
 0x672   :  { %v522_v37 = vpop.eup %521 }
 0x6d5   :  { %v362_v35 = vpop.permute.xlu1 %361 }
 0x6d6   :  { %v368_v36 = vmul.f32 %v520_v34, %v362_v35 }
 0x6d8   :  { %372 = vrot.lane.b32.xlu1 %v368_v36, %s608_s14 }
 0x6d9   :  { %v366_v38 = vpop.permute.xlu0 %365 }
 0x6da   :  { %v369_v15 = vmul.f32 %v522_v37, %v366_v38  ;;  %v382_v39 = vpop.permute.xlu1 %381 }
 0x6db   :  { %v388_v40 = vmul.f32 %v520_v34, %v382_v39 }
 0x6dc   :  { %374 = vrot.lane.b32.xlu1 %v369_v15, %s608_s14 }
 0x6dd   :  { %392 = vrot.lane.b32.xlu0 %v388_v40, %s609_s2 }
 0x6de   :  { %v386_v16 = vpop.permute.xlu1 %385 }
 0x6df   :  { %v389_v41 = vmul.f32 %v522_v37, %v386_v16 }
 0x6e1   :  { %394 = vrot.lane.b32.xlu1 %v389_v41, %s609_s2 }
 0x6e3   :  { %v402_v42 = vpop.permute.xlu1 %401 }
 0x6e4   :  { %v408_v43 = vmul.f32 %v520_v34, %v402_v42 }
 0x6e6   :  { %412 = vrot.lane.b32.xlu0 %v408_v43, %s610_s15 }
 0x6e7   :  { %v406_v44 = vpop.permute.xlu1 %405 }
 0x6e8   :  { %v409_v45 = vmul.f32 %v522_v37, %v406_v44 }
 0x6ea   :  { %414 = vrot.lane.b32.xlu1 %v409_v45, %s610_s15 }
 0x6ec   :  { %v349_v46 = vpop.permute.xlu1 %348 }
 0x6ed   :  { %v356_v50 = vmul.f32 %v520_v34, %v349_v46 }
 0x6f0   :  { %v354_v47 = vpop.permute.xlu1 %353 }
 0x6f1   :  { %v357_v53 = vmul.f32 %v522_v37, %v354_v47 }
 0x74a   :  { %v373_v48 = vpop.permute.xlu1 %372 }
 0x74b   :  { %v378_v52 = vadd.f32 %v373_v48, %v356_v50 }
 0x74e   :  { %v375_v49 = vpop.permute.xlu1 %374 }
 0x74f   :  { %v393_v51 = vpop.permute.xlu0 %392  ;;  %v379_v58 = vadd.f32 %v375_v49, %v357_v53 }
 0x750   :  { %v398_v54 = vadd.f32 %v393_v51, %v378_v52 }
 0x753   :  { %v395_v55 = vpop.permute.xlu1 %394 }
 0x754   :  { %v399_v60 = vadd.f32 %v395_v55, %v379_v58 }
 0x758   :  { %v413_v56 = vpop.permute.xlu0 %412 }
 0x759   :  { %v418_v59 = vadd.f32 %v413_v56, %v398_v54 }
 0x75b   :  { %v422_v61 = vadd.f32 %v420_v57, %v418_v59 }
 0x75c   :  { %v415_v62 = vpop.permute.xlu1 %414 }
 0x75d   :  { %424 = vst.msk [vmem:[#allocation2] sm:$0xff] %vm47_vm0, %v422_v61  ;;  %v419_v0 = vadd.f32 %v415_v62, %v399_v60 }
 0x75f   :  { %v423_v1 = vadd.f32 %v421_v63, %v419_v0 }
 0x761   :  { %425 = vst.msk [vmem:[#allocation2 + $0x8] sm:$0xff] %vm47_vm0, %v423_v1 }
 0x764   :  { %v429_v2 = vld [vmem:[#allocation2] sm:$0xff] }
 0x765   :  { %v431_v4 = vsel %vm47_vm0, %v429_v2, 0.0 }
 0x768   :  { %v430_v3 = vld [vmem:[#allocation2 + $0x8] sm:$0xff] }
 0x769   :  { %v432_v5 = vsel %vm47_vm0, %v430_v3, 0.0 }
 0x76a   :  { %v433_v6 = vadd.f32 %v432_v5, %v431_v4 }
 0x76c   :  { %v434_v7 = vrot.slane %v433_v6, 4 }
 0x76e   :  { %v435_v10 = vadd.f32 %v434_v7, %v433_v6 }
 0x770   :  { %v436_v11 = vrot.slane %v435_v10, 2 }
 0x772   :  { %v437_v13 = vadd.f32 %v436_v11, %v435_v10 }
 0x774   :  { %v438_v14 = vrot.slane %v437_v13, 1 }
 0x776   :  { %v439_v17 = vadd.f32 %v438_v14, %v437_v13 }
 0x778   :  { %v440_v18 = vmul.f32 0.0625, %v439_v17 }
 0x77a   :  { %442 = vst.msk [vmem:[#allocation8] sm:$0x1] %vm441_vm11, %v440_v18 }
 0x77b   :  { %578 = shalt.err (!%p575_p6)
}
 0x77c   :  { %s579_s22 = scalar_lea.hbm %s750_s3, 16 }
 0x77d   :  { %p580_p7 = scmp.ne.s32.totalorder %s750_s3, %s579_s22  ;;  %p583_p8 = scmp.lt.u32.totalorder %s579_s22, %s750_s3 }
 0x77f   :  { %p585_p9 = pnand %p583_p8, %p580_p7 }
 0x781   :  { %588 = shalt.err (!%p585_p9)
}
 0x782   :  { %452 = dma.vmem_to_hbm [thread:$0]  %s450_s17, 16, %s750_s3, [#allocation5]  }
 0x783   :  { %593 = dma.done.wait [#allocation5], 16  }
 0x784   :  { %594 = vsyncadd [#allocation5], 4294967280 }
 0x785   :  { %456 = vsyncpa [#allocation4], 1 }
 0x786   :  { %457 = vsyncpa [#allocation7], 1 }
 0x787   :  { %458 = vsyncpa [#allocation5], 1 }

</bundles_post_ra>
